<compile_context>
chip_gen: v7x
topology: tpu7x:2x2x1
jax: 0.10.0
libtpu: 0.0.40
codegen_flags: <defaults>
</compile_context>

<pallas_src>
import functools
import math

import jax
import jax.numpy as jnp
from jax import lax
from jax.experimental import pallas as pl
from jax.experimental.pallas import tpu as pltpu


def _tile(dim, desired, unit):
    """Largest tile <= desired that divides dim and is a multiple of unit,
    else the full dim (block == full array dim is always legal)."""
    if dim <= desired:
        return dim
    t = (desired // unit) * unit
    while t >= unit:
        if dim % t == 0:
            return t
        t -= unit
    return dim


def _pick_head_block(num_heads, head_dim):
    """Heads per attention grid step: make the lane width a multiple of 128
    (MXU/lane friendly) when possible, else take all heads (full-dim block)."""
    for target in (256, 128):
        if target % head_dim == 0:
            hb = target // head_dim
            if hb <= num_heads and num_heads % hb == 0:
                return hb
    return num_heads


# ---------------------------------------------------------------------------
# Tiled linear kernel: y = x @ w + b   (w already stored as (K, N))
# ---------------------------------------------------------------------------
def _linear_kernel(x_ref, w_ref, b_ref, o_ref, acc_ref, *, precision):
    @pl.when(pl.program_id(2) == 0)
    def _():
        acc_ref[...] = jnp.zeros_like(acc_ref)

    acc_ref[...] += jnp.dot(x_ref[...], w_ref[...],
                            preferred_element_type=jnp.float32,
                            precision=precision)

    @pl.when(pl.program_id(2) == pl.num_programs(2) - 1)
    def _():
        o_ref[...] = (acc_ref[...] +
                      b_ref[...].astype(jnp.float32)).astype(o_ref.dtype)


def linear(x, w, b, *, precision, tm=256, tn=256, tk=512):
    """x: (M, K), w: (K, N) pre-transposed, b: (N,) -> (M, N)."""
    M, K = x.shape
    N = w.shape[1]
    tm = _tile(M, tm, 8)
    tn = _tile(N, tn, 128)
    tk = _tile(K, tk, 128)
    kernel = functools.partial(_linear_kernel, precision=precision)
    return pl.pallas_call(
        kernel,
        grid=(M // tm, N // tn, K // tk),
        in_specs=[
            pl.BlockSpec((tm, tk), lambda i, j, k: (i, k)),
            pl.BlockSpec((tk, tn), lambda i, j, k: (k, j)),
            pl.BlockSpec((1, tn), lambda i, j, k: (0, j)),
        ],
        out_specs=pl.BlockSpec((tm, tn), lambda i, j, k: (i, j)),
        out_shape=jax.ShapeDtypeStruct((M, N), x.dtype),
        scratch_shapes=[pltpu.VMEM((tm, tn), jnp.float32)],
        compiler_params=pltpu.CompilerParams(
            dimension_semantics=("parallel", "parallel", "arbitrary")),
    )(x, w, b.reshape(1, N))


# ---------------------------------------------------------------------------
# Attention kernels.  Blocks are (1, tq, hb*d) slices of the (b, n, h*d)
# activations; the head split lives entirely in the BlockSpec / in-kernel
# static loop, so no HBM-level transposes are needed.
# ---------------------------------------------------------------------------
def _attn_heads(qb, kb, vb, head_dim, scale, out_dtype, collect_probs,
                precision):
    """Shared per-block attention math. qb: (tq, hb*d), kb/vb: (n_k, hb*d)."""
    hb = qb.shape[1] // head_dim
    o_parts = []
    w_acc = None
    for hh in range(hb):
        sl = slice(hh * head_dim, (hh + 1) * head_dim)
        qh = qb[:, sl] * jnp.asarray(scale, qb.dtype)      # scale folded into q
        kh = kb[:, sl]
        vh = vb[:, sl]
        s = lax.dot_general(qh, kh, (((1,), (1,)), ((), ())),
                            preferred_element_type=jnp.float32,
                            precision=precision)           # (tq, n_k)
        m = jnp.max(s, axis=-1, keepdims=True)
        p = jnp.exp(s - m)
        denom = jnp.sum(p, axis=-1, keepdims=True)
        probs = p / denom                                   # exact normalize
        o_parts.append(jnp.dot(probs.astype(vh.dtype), vh,
                               preferred_element_type=jnp.float32,
                               precision=precision))
        if collect_probs:
            w_acc = probs if w_acc is None else w_acc + probs
    o = jnp.concatenate(o_parts, axis=-1).astype(out_dtype)       # lane-dense
    return o, w_acc


def _attn_kernel_weights(q_ref, k_ref, v_ref, o_ref, w_ref, *,
                         head_dim, inv_num_heads, scale, precision):
    @pl.when(pl.program_id(2) == 0)
    def _():
        w_ref[...] = jnp.zeros_like(w_ref)

    o, w_acc = _attn_heads(q_ref[0], k_ref[0], v_ref[0],
                           head_dim, scale, o_ref.dtype, True, precision)
    o_ref[0] = o
    # head-mean accumulated in-kernel across the (arbitrary) head-block axis.
    w_ref[0] = w_ref[0] + w_acc * inv_num_heads


def _attn_kernel_noweights(q_ref, k_ref, v_ref, o_ref, *,
                           head_dim, scale, precision):
    o, _ = _attn_heads(q_ref[0], k_ref[0], v_ref[0],
                       head_dim, scale, o_ref.dtype, False, precision)
    o_ref[0] = o


def mha_attention(q, k, v, num_heads, head_dim, scale, return_weights,
                  precision):
    """q: (b, n_q, h*d), k/v: (b, n_k, h*d) -> attn (b, n_q, h*d)
    [, head-averaged probs (b, n_q, n_k)]."""
    b, n_q, dm = q.shape
    n_k = k.shape[1]
    hb = _pick_head_block(num_heads, head_dim)
    n_hblk = num_heads // hb
    tq = _tile(n_q, 256, 8)
    hw = hb * head_dim

    # TODO(synk): flash-style n_k tiling (online softmax) for very long
    # sequences so a full (tq, n_k) score tile never has to fit VMEM (v7x).
    q_spec = pl.BlockSpec((1, tq, hw), lambda bi, qi, j: (bi, qi, j))
    kv_spec = pl.BlockSpec((1, n_k, hw), lambda bi, qi, j: (bi, 0, j))
    o_spec = pl.BlockSpec((1, tq, hw), lambda bi, qi, j: (bi, qi, j))
    grid = (b, n_q // tq, n_hblk)

    if return_weights:
        kernel = functools.partial(_attn_kernel_weights, head_dim=head_dim,
                                   inv_num_heads=1.0 / num_heads, scale=scale,
                                   precision=precision)
        return pl.pallas_call(
            kernel,
            grid=grid,
            in_specs=[q_spec, kv_spec, kv_spec],
            out_specs=(o_spec,
                       pl.BlockSpec((1, tq, n_k), lambda bi, qi, j: (bi, qi, 0))),
            out_shape=(jax.ShapeDtypeStruct((b, n_q, dm), q.dtype),
                       jax.ShapeDtypeStruct((b, n_q, n_k), jnp.float32)),
            compiler_params=pltpu.CompilerParams(
                dimension_semantics=("parallel", "parallel", "arbitrary")),
        )(q, k, v)

    kernel = functools.partial(_attn_kernel_noweights, head_dim=head_dim,
                               scale=scale, precision=precision)
    return pl.pallas_call(
        kernel,
        grid=grid,
        in_specs=[q_spec, kv_spec, kv_spec],
        out_specs=o_spec,
        out_shape=jax.ShapeDtypeStruct((b, n_q, dm), q.dtype),
        compiler_params=pltpu.CompilerParams(
            dimension_semantics=("parallel", "parallel", "parallel")),
    )(q, k, v)


# ---------------------------------------------------------------------------
# Full forward
# ---------------------------------------------------------------------------
def multihead_attention_forward(query, key, value, params, num_heads,
                                need_weights=True, average_attn_weights=True,
                                precision=lax.Precision.HIGHEST):
    # precision=HIGHEST reproduces the f32 semantics of the PyTorch module for
    # f32 inputs; for bf16 inputs it costs nothing extra on the MXU.
    b, n_q, e = query.shape
    n_k = key.shape[1]
    w_in = params["in_proj_weight"]            # (3*d_model, e), PyTorch layout
    b_in = params["in_proj_bias"]              # (3*d_model,)
    d_model = w_in.shape[0] // 3
    head_dim = d_model // num_heads
    assert d_model % num_heads == 0

    w_in_t = w_in.T                            # (e, 3*d_model): transpose once

    if (query is key) and (key is value):
        # Self-attention: one fused (M, E) x (E, 3*d_model) projection.
        qkv = linear(query.reshape(b * n_q, e), w_in_t, b_in,
                     precision=precision)
        q2, k2, v2 = jnp.split(qkv, 3, axis=-1)
        q = q2.reshape(b, n_q, d_model)
        k = k2.reshape(b, n_k, d_model)
        v = v2.reshape(b, n_k, d_model)
    else:
        w_q, w_k, w_v = jnp.split(w_in_t, 3, axis=1)
        b_q, b_k, b_v = jnp.split(b_in, 3, axis=0)
        q = linear(query.reshape(b * n_q, e), w_q, b_q,
                   precision=precision).reshape(b, n_q, d_model)
        k = linear(key.reshape(b * n_k, e), w_k, b_k,
                   precision=precision).reshape(b, n_k, d_model)
        v = linear(value.reshape(b * n_k, e), w_v, b_v,
                   precision=precision).reshape(b, n_k, d_model)

    scale = 1.0 / math.sqrt(head_dim)

    if need_weights and not average_attn_weights:
        # TODO(synk): per-head attention-weights output (average_attn_weights=False).
        raise NotImplementedError("average_attn_weights=False not implemented")

    if need_weights:
        attn, probs = mha_attention(q, k, v, num_heads, head_dim, scale, True,
                                    precision)
    else:
        attn = mha_attention(q, k, v, num_heads, head_dim, scale, False,
                             precision)

    # attn is already in (b, n_q, h*d) layout: no transpose before out_proj.
    out = linear(attn.reshape(b * n_q, d_model),
                 params["out_proj_weight"].T,
                 params["out_proj_bias"],
                 precision=precision).reshape(b, n_q, e)

    if need_weights:
        return out, probs
    return out


# ---------------------------------------------------------------------------
# Pure-JAX reference for correctness checking
# ---------------------------------------------------------------------------
def reference_forward(query, key, value, params, num_heads):
    prec = lax.Precision.HIGHEST
    b, n_q, e = query.shape
    head_dim = e // num_heads
    w_q, w_k, w_v = jnp.split(params["in_proj_weight"], 3, axis=0)
    b_q, b_k, b_v = jnp.split(params["in_proj_bias"], 3, axis=0)
    q = jnp.dot(query, w_q.T, precision=prec) + b_q
    k = jnp.dot(key, w_k.T, precision=prec) + b_k
    v = jnp.dot(value, w_v.T, precision=prec) + b_v
    q = q.reshape(b, -1, num_heads, head_dim).transpose(0, 2, 1, 3)
    k = k.reshape(b, -1, num_heads, head_dim).transpose(0, 2, 1, 3)
    v = v.reshape(b, -1, num_heads, head_dim).transpose(0, 2, 1, 3)
    s = jnp.einsum("bhqd,bhkd->bhqk", q, k, precision=prec) / math.sqrt(head_dim)
    p = jax.nn.softmax(s, axis=-1)
    o = jnp.einsum("bhqk,bhkd->bhqd", p, v, precision=prec)
    o = o.transpose(0, 2, 1, 3).reshape(b, -1, e)
    out = jnp.dot(o, params["out_proj_weight"].T, precision=prec)
    out = out + params["out_proj_bias"]
    return out, p.mean(axis=1)


if __name__ == "__main__":
    b, seq, embed_dim, num_heads = 2, 8, 32, 4

    keys = jax.random.split(jax.random.PRNGKey(0), 7)
    x = jax.random.normal(keys[0], (b, seq, embed_dim), jnp.float32)
    key_in = jax.random.normal(keys[1], (b, seq, embed_dim), jnp.float32)
    value = jax.random.normal(keys[2], (b, seq, embed_dim), jnp.float32)

    # Well-conditioned weights (O(1) attention logits) so the numerical
    # comparison is not dominated by an over-saturated softmax.
    w_scale = 1.0 / math.sqrt(embed_dim)
    params = {
        "in_proj_weight": w_scale * jax.random.normal(
            keys[3], (3 * embed_dim, embed_dim), jnp.float32),
        "in_proj_bias": 0.1 * jax.random.normal(keys[4], (3 * embed_dim,),
                                                jnp.float32),
        "out_proj_weight": 0.1 * jax.random.normal(
            keys[5], (embed_dim, embed_dim), jnp.float32),
        "out_proj_bias": 0.1 * jax.random.normal(keys[6], (embed_dim,),
                                                 jnp.float32),
    }

    # 1) self-attention: exercises the fused packed QKV projection path.
    out1, w1 = multihead_attention_forward(x, x, x, params, num_heads)
    ref1, rw1 = reference_forward(x, x, x, params, num_heads)
    # 2) cross-attention: exercises the separate projection path.
    out2, w2 = multihead_attention_forward(x, key_in, value, params, num_heads)
    ref2, rw2 = reference_forward(x, key_in, value, params, num_heads)
    # 3) need_weights=False path (no probs kernel output).
    out3 = multihead_attention_forward(x, key_in, value, params, num_heads,
                                       need_weights=False)
    jax.block_until_ready((out1, w1, out2, w2, out3))

    assert out1.shape == (b, seq, embed_dim) and w1.shape == (b, seq, seq)
    assert out2.shape == (b, seq, embed_dim) and w2.shape == (b, seq, seq)
    assert out3.shape == (b, seq, embed_dim)
    atol = rtol = 5e-3
    assert jnp.allclose(out1, ref1, atol=atol, rtol=rtol)
    assert jnp.allclose(out2, ref2, atol=atol, rtol=rtol)
    assert jnp.allclose(out3, ref2, atol=atol, rtol=rtol)
    assert jnp.allclose(w1, rw1, atol=atol, rtol=rtol)
    assert jnp.allclose(w2, rw2, atol=atol, rtol=rtol)

    print("KERNEL_OK")
</pallas_src>

<mosaic_0001>
module attributes {stable_mosaic.version = 11 : i64} {
  func.func @_linear_kernel(%arg0: i32, %arg1: i32, %arg2: i32, %arg3: memref<16x32xf32, #tpu.memory_space<vmem>>, %arg4: memref<32x96xf32, #tpu.memory_space<vmem>>, %arg5: memref<1x96xf32, #tpu.memory_space<vmem>>, %arg6: memref<16x96xf32, #tpu.memory_space<vmem>>, %arg7: memref<16x96xf32, #tpu.memory_space<vmem>>) attributes {dimension_semantics = [#tpu.dimension_semantics<parallel>, #tpu.dimension_semantics<parallel>, #tpu.dimension_semantics<arbitrary>], iteration_bounds = array<i64: 1, 1, 1>, scalar_prefetch = 0 : i64, scratch_operands = 1 : i64, tpu.core_type = #tpu.core_type<tc>, window_params = [{transform_indices = @transform_0, window_bounds = array<i64: 16, 32>}, {transform_indices = @transform_1, window_bounds = array<i64: 32, 96>}, {transform_indices = @transform_2, window_bounds = array<i64: 1, 96>}, {transform_indices = @transform_3, window_bounds = array<i64: 16, 96>}]} {
    %c0_i32 = arith.constant 0 : i32
    %0 = arith.cmpi eq, %arg2, %c0_i32 : i32
    %1 = arith.extui %0 : i1 to i32
    %c0_i32_0 = arith.constant 0 : i32
    %2 = arith.cmpi ne, %1, %c0_i32_0 : i32
    scf.if %2 {
      %cst_10 = arith.constant 0.000000e+00 : f32
      %12 = vector.broadcast %cst_10 : f32 to vector<16x96xf32>
      %c0_11 = arith.constant 0 : index
      %c0_12 = arith.constant 0 : index
      %13 = vector.load %arg7[%c0_11, %c0_12] : memref<16x96xf32, #tpu.memory_space<vmem>>, vector<16x96xf32>
      tpu.vector_store %arg7[%c0_11, %c0_12], %12 {strides = array<i32>} : memref<16x96xf32, #tpu.memory_space<vmem>>, vector<16x96xf32>,
    } else {
    }
    %c0 = arith.constant 0 : index
    %c0_1 = arith.constant 0 : index
    %3 = vector.load %arg7[%c0, %c0_1] : memref<16x96xf32, #tpu.memory_space<vmem>>, vector<16x96xf32>
    %c0_2 = arith.constant 0 : index
    %c0_3 = arith.constant 0 : index
    %4 = vector.load %arg3[%c0_2, %c0_3] : memref<16x32xf32, #tpu.memory_space<vmem>>, vector<16x32xf32>
    %c0_4 = arith.constant 0 : index
    %c0_5 = arith.constant 0 : index
    %5 = vector.load %arg4[%c0_4, %c0_5] : memref<32x96xf32, #tpu.memory_space<vmem>>, vector<32x96xf32>
    %cst = arith.constant dense<0.000000e+00> : vector<16x96xf32>
    %6 = tpu.matmul %4, %5, %cst {dimension_numbers = #tpu.dot_dimension_numbers<[1], [0], [0], [1], [0, 0, 1, 1], [], []>, precision = #tpu.contract_precision<fp32>} : vector<16x32xf32>, vector<32x96xf32>, vector<16x96xf32> -> vector<16x96xf32>
    %7 = arith.addf %3, %6 : vector<16x96xf32>
    %c0_6 = arith.constant 0 : index
    %c0_7 = arith.constant 0 : index
    %8 = vector.load %arg7[%c0_6, %c0_7] : memref<16x96xf32, #tpu.memory_space<vmem>>, vector<16x96xf32>
    tpu.vector_store %arg7[%c0_6, %c0_7], %7 {strides = array<i32>} : memref<16x96xf32, #tpu.memory_space<vmem>>, vector<16x96xf32>,
    %c0_i32_8 = arith.constant 0 : i32
    %9 = arith.cmpi eq, %arg2, %c0_i32_8 : i32
    %10 = arith.extui %9 : i1 to i32
    %c0_i32_9 = arith.constant 0 : i32
    %11 = arith.cmpi ne, %10, %c0_i32_9 : i32
    scf.if %11 {
      %c0_10 = arith.constant 0 : index
      %c0_11 = arith.constant 0 : index
      %12 = vector.load %arg7[%c0_10, %c0_11] : memref<16x96xf32, #tpu.memory_space<vmem>>, vector<16x96xf32>
      %c0_12 = arith.constant 0 : index
      %c0_13 = arith.constant 0 : index
      %13 = vector.load %arg5[%c0_12, %c0_13] : memref<1x96xf32, #tpu.memory_space<vmem>>, vector<1x96xf32>
      %14 = vector.broadcast %13 : vector<1x96xf32> to vector<16x96xf32>
      %15 = arith.addf %12, %14 : vector<16x96xf32>
      %c0_14 = arith.constant 0 : index
      %c0_15 = arith.constant 0 : index
      %16 = vector.load %arg6[%c0_14, %c0_15] : memref<16x96xf32, #tpu.memory_space<vmem>>, vector<16x96xf32>
      tpu.vector_store %arg6[%c0_14, %c0_15], %15 {strides = array<i32>} : memref<16x96xf32, #tpu.memory_space<vmem>>, vector<16x96xf32>,
    } else {
    }
    return
  }
  func.func @transform_0(%arg0: i32, %arg1: i32, %arg2: i32) -> (i32, i32) {
    %c0_i32 = arith.constant 0 : i32
    return %arg0, %arg2 : i32, i32
  }
  func.func @transform_1(%arg0: i32, %arg1: i32, %arg2: i32) -> (i32, i32) {
    %c0_i32 = arith.constant 0 : i32
    return %arg2, %arg1 : i32, i32
  }
  func.func @transform_2(%arg0: i32, %arg1: i32, %arg2: i32) -> (i32, i32) {
    %c0_i32 = arith.constant 0 : i32
    %c0_i32_0 = arith.constant 0 : i32
    return %c0_i32, %arg1 : i32, i32
  }
  func.func @transform_3(%arg0: i32, %arg1: i32, %arg2: i32) -> (i32, i32) {
    %c0_i32 = arith.constant 0 : i32
    return %arg0, %arg1 : i32, i32
  }
}

</mosaic_0001>

<bundles_post_ra>
// kernel: tpu_custom_call.1
= control target key start
LH: loop header
LB: loop body
LE: loop exit
PB: predicated region body
PF: predicated region fallthrough
CT: control target
= control target key end

     0   :  { %8 = vsyncpa [#allocation4], 0  ;;  %s963_s0 = inlined_call_operand.hbm [shape: f32[16,32], index: 0, kind: input, shape index: {}]   ;;  %s964_s1 = inlined_call_operand.hbm [shape: f32[32,96], index: 1, kind: input, shape index: {}]   ;;  %s965_s2 = inlined_call_operand.vmem [shape: f32[1,96], index: 2, kind: input, shape index: {}]   ;;  %s966_s3 = inlined_call_operand.hbm [shape: f32[16,96], index: 3, kind: output, shape index: {}]  }
   0x1   :  { %9 = vsyncpa [#allocation7], 0 }
   0x2   :  { %10 = vsyncpa [#allocation5], 0  ;;  %s871_s12 = smov [#allocation3]   ;;  %s799_s16 = scalar_lea.hbm %s963_s0, 256 }
   0x3   :  { %s16_s13 = sshll.u32 %s871_s12, 4  ;;  %p800_p0 = scmp.ne.s32.totalorder %s963_s0, %s799_s16  ;;  %s17_s13 = int_to_ptr.vmem [resolvable:$true] %s16_s13 }
   0x4   :  { %p803_p1 = scmp.lt.u32.totalorder %s799_s16, %s963_s0 }
   0x6   :  { %p805_p2 = pnand %p803_p1, %p800_p0 }
   0x8   :  { %808 = shalt.err (!%p805_p2)
}
   0x9   :  { %s809_s21 = scalar_lea.vmem %s17_s13, 256  ;;  %p814_p4 = scmp.lt.s32.totalorder %s17_s13, %s17_s13 }
   0xa   :  { %p810_p3 = scmp.ne.s32.totalorder %s17_s13, %s809_s21  ;;  %p815_p5 = scmp.lt.s32.totalorder %s809_s21, %s809_s21 }
   0xc   :  { %p816_p6 = por %p815_p5, %p814_p4 }
   0xe   :  { %p817_p7 = pnand %p816_p6, %p810_p3 }
  0x10   :  { %820 = shalt.err (!%p817_p7)
}
  0x11   :  { %s872_s22 = smov 128   ;;  %s873_s23 = smov 8  }
  0x12   :  { %22 = dma.hbm_to_vmem [thread:$0]  %s963_s0, 256, %s17_s13, [#allocation4], %s872_s22, %s872_s22, %s873_s23  }
  0x13   :  { %s874_s26 = smov [#allocation6]   ;;  %s821_s30 = scalar_lea.hbm %s964_s1, 512 }
  0x14   :  { %s28_s27 = sshll.u32 %s874_s26, 4  ;;  %p822_p8 = scmp.ne.s32.totalorder %s964_s1, %s821_s30  ;;  %s29_s27 = int_to_ptr.vmem [resolvable:$true] %s28_s27 }
  0x15   :  { %p825_p9 = scmp.lt.u32.totalorder %s821_s30, %s964_s1 }
  0x17   :  { %p827_p10 = pnand %p825_p9, %p822_p8 }
  0x19   :  { %830 = shalt.err (!%p827_p10)
}
  0x1a   :  { %s831_s8 = scalar_lea.vmem %s29_s27, 512  ;;  %p836_p12 = scmp.lt.s32.totalorder %s29_s27, %s29_s27 }
  0x1b   :  { %p832_p11 = scmp.ne.s32.totalorder %s29_s27, %s831_s8  ;;  %p837_p13 = scmp.lt.s32.totalorder %s831_s8, %s831_s8 }
  0x1d   :  { %p838_p0 = por %p837_p13, %p836_p12 }
  0x1f   :  { %p839_p1 = pnand %p838_p0, %p832_p11 }
  0x21   :  { %842 = shalt.err (!%p839_p1)
}
  0x22   :  { %34 = dma.hbm_to_vmem [thread:$0]  %s964_s1, 512, %s29_s27, [#allocation7], %s872_s22, %s872_s22, %s873_s23  }
  0x23   :  { %865 = dma.done.wait [#allocation4], 256  }
  0x24   :  { %866 = vsyncadd [#allocation4], 4294967040 }
  0x25   :  { %867 = dma.done.wait [#allocation7], 512  }
  0x26   :  { %868 = vsyncadd [#allocation7], 4294966784  ;;  %vm58_vm0 = vcmask 261120   ;;  %v54_v0 = vld [vmem:[#allocation6] sm:$0xff]  ;;  %v55_v1 = vld [vmem:[#allocation6 + $0x8] sm:$0xff]  ;;  %vm47_vm1 = vcmask 785408  }
  0x27   :  { %v56_v2 = vld [vmem:[#allocation6 + $0x10] sm:$0xff]  ;;  %v66_v3 = vand.u32 4294901760, %v54_v0  ;;  %v69_v4 = vand.u32 4294901760, %v55_v1  ;;  %v57_v5 = vld [vmem:[#allocation6 + $0x18] sm:$0xff]  ;;  %v875_v46 = vmov 0.0   ;;  %s876_s11 = smov [#allocation8]  }
  0x28   :  { %v72_v6 = vand.u32 4294901760, %v56_v2  ;;  %v52_v7 = vld [vmem:[#allocation3] sm:$0xff]  ;;  %v53_v8 = vld [vmem:[#allocation3 + $0x8] sm:$0xff]  ;;  %v75_v9 = vand.u32 4294901760, %v57_v5  ;;  %49 = vst.msk [vmem:[#allocation2 + $0x8] sm:$0xff] %vm47_vm1, %v875_v46  ;;  %48 = vst.msk [vmem:[#allocation2] sm:$0xff] %vm47_vm1, %v875_v46 }
  0x29   :  { %v60_v10 = vsel %vm58_vm0, %v52_v7, 0  ;;  %v63_v11 = vsel %vm58_vm0, %v53_v8, 0  ;;  %v735_v12 = vpack.c.bf16 %v69_v4, %v66_v3  ;;  %v156_v15 = vsub.f32 %v54_v0, %v66_v3  ;;  %v632_v57 = vld [vmem:[%s965_s2] ss:$0 sm:$0xff]  ;;  %s619_s12 = sshll.u32 %s876_s11, 4  ;;  %s620_s12 = int_to_ptr.vmem [resolvable:$true] %s619_s12 }
  0x2a   :  { %v927_v13 = vand.u32 4294901760, %v60_v10  ;;  %v929_v14 = vand.u32 4294901760, %v63_v11  ;;  %v739_v16 = vpack.c.bf16 %v75_v9, %v72_v6  ;;  %v163_v17 = vsub.f32 %v55_v1, %v69_v4  ;;  %s843_s13 = scalar_lea.vmem %s620_s12, 256  ;;  %p848_p3 = scmp.lt.s32.totalorder %s620_s12, %s620_s12 }
  0x2b   :  { %v170_v18 = vsub.f32 %v56_v2, %v72_v6  ;;  %v177_v19 = vsub.f32 %v57_v5, %v75_v9  ;;  %736 = vmatprep.subr.bf16.mxu1 %v735_v12  ;;  %760 = vmatprep.subr.bf16.mxu0 %v735_v12  ;;  %v157_v22 = vand.u32 4294901760, %v156_v15  ;;  %p844_p2 = scmp.ne.s32.totalorder %s620_s12, %s843_s13  ;;  %p849_p4 = scmp.lt.s32.totalorder %s843_s13, %s843_s13 }
  0x2c   :  { %v135_v20 = vsub.f32 %v60_v10, %v927_v13  ;;  %v145_v21 = vsub.f32 %v63_v11, %v929_v14  ;;  %738 = vmatpush3.bf16.msra.mxu1 %v735_v12  ;;  %762 = vmatpush3.bf16.msra.mxu0 %v735_v12  ;;  %v164_v23 = vand.u32 4294901760, %v163_v17  ;;  %v751_v44 = vpack.c.bf16 %v163_v17, %v156_v15 }
  0x2d   :  { %v171_v24 = vand.u32 4294901760, %v170_v18  ;;  %v178_v25 = vand.u32 4294901760, %v177_v19  ;;  %740 = vmatprep.subr.bf16.mxu1 %v739_v16  ;;  %764 = vmatprep.subr.bf16.mxu0 %v739_v16  ;;  %v158_v28 = vsub.f32 %v156_v15, %v157_v22  ;;  %v755_v45 = vpack.c.bf16 %v177_v19, %v170_v18  ;;  %p850_p5 = por %p849_p4, %p848_p3 }
  0x2e   :  { %v136_v26 = vand.u32 4294901760, %v135_v20  ;;  %v146_v27 = vand.u32 4294901760, %v145_v21  ;;  %v165_v29 = vsub.f32 %v163_v17, %v164_v23  ;;  %v767_v30 = vpack.c.bf16 %v164_v23, %v157_v22 }
  0x2f   :  { %v172_v31 = vsub.f32 %v170_v18, %v171_v24  ;;  %v179_v32 = vsub.f32 %v177_v19, %v178_v25  ;;  %v159_v35 = vand.u32 4294901760, %v158_v28  ;;  %v771_v43 = vpack.c.bf16 %v178_v25, %v171_v24  ;;  %v51_v48 = vld [vmem:[#allocation2 + $0x8] sm:$0xff]  ;;  %v50_v52 = vld [vmem:[#allocation2] sm:$0xff]  ;;  %p851_p6 = pnand %p850_p5, %p844_p2 }
  0x30   :  { %v137_v33 = vsub.f32 %v135_v20, %v136_v26  ;;  %710 = vmatprep.mubr.f32.mxu0 %v136_v26  ;;  %v147_v34 = vsub.f32 %v145_v21, %v146_v27  ;;  %742 = vmatpush3.bf16.msra.mxu1 %v739_v16  ;;  %v166_v36 = vand.u32 4294901760, %v165_v29 }
  0x31   :  { %766 = vmatpush3.bf16.msra.mxu0 %v739_v16  ;;  %v173_v37 = vand.u32 4294901760, %v172_v31  ;;  %v180_v38 = vand.u32 4294901760, %v179_v32 }
  0x32   :  { %v138_v39 = vand.u32 4294901760, %v137_v33  ;;  %v148_v40 = vand.u32 4294901760, %v147_v34  ;;  %768 = vmatprep.subr.bf16.mxu0 %v767_v30  ;;  %v743_v41 = vpack.c.bf16 %v166_v36, %v159_v35 }
  0x33   :  { %v747_v42 = vpack.c.bf16 %v180_v38, %v173_v37 }
  0x34   :  { %677 = vmatprep.mubr.f32.mxu1 %v138_v39  ;;  %711 = vmatmul.mubr.f32.vlgmr.msra.gmra.mrb[0].mxu0 %v146_v27 }
  0x35   :  { %678 = vmatmul.mubr.f32.vlgmr.msra.gmra.mrb[0].mxu1 %v148_v40  ;;  %744 = vmatprep.subr.bf16.mxu1 %v743_v41 }
  0x36   :  { %746 = vmatpush3.bf16.msra.mxu1 %v743_v41  ;;  %770 = vmatpush3.bf16.msra.mxu0 %v767_v30 }
  0x37   :  { %748 = vmatprep.subr.bf16.mxu1 %v747_v42  ;;  %772 = vmatprep.subr.bf16.mxu0 %v771_v43 }
  0x38   :  { %688 = vmatprep.mubr.f32.mxu1 %v927_v13  ;;  %721 = vmatprep.mubr.f32.mxu0 %v927_v13 }
  0x3a   :  { %750 = vmatpush3.bf16.msra.mxu1 %v747_v42  ;;  %774 = vmatpush3.bf16.msra.mxu0 %v771_v43 }
  0x3b   :  { %752 = vmatprep.subr.bf16.mxu1 %v751_v44  ;;  %776 = vmatprep.subr.bf16.mxu0 %v735_v12 }
  0x3d   :  { %689 = vmatmul.mubr.f32.vlgmr.msra.gmra.mrb[0].mxu1 %v929_v14  ;;  %722 = vmatmul.mubr.f32.vlgmr.msra.gmra.mrb[0].mxu0 %v929_v14 }
  0x3e   :  { %754 = vmatpush3.bf16.msra.mxu1 %v751_v44  ;;  %778 = vmatpush3.bf16.msra.mxu0 %v735_v12 }
  0x3f   :  { %756 = vmatprep.subr.bf16.mxu1 %v755_v45  ;;  %780 = vmatprep.subr.bf16.mxu0 %v739_v16 }
  0x40   :  { %699 = vmatprep.mubr.f32.mxu1 %v135_v20  ;;  %732 = vmatprep.mubr.f32.mxu0 %v927_v13 }
  0x42   :  { %758 = vmatpush3.bf16.msra.mxu1 %v755_v45  ;;  %782 = vmatpush3.bf16.msra.mxu0 %v739_v16 }
  0x45   :  { %700 = vmatmul.mubr.f32.vlgmr.msra.gmra.mrb[0].mxu1 %v145_v21  ;;  %733 = vmatmul.mubr.f32.vlgmr.msra.gmra.mrb[0].mxu0 %v929_v14 }
 0x118   :  { %v701_v47 = vpop.f32.mrb[0].mxu1  ;;  %v734_v49 = vpop.f32.mrb[0].mxu0 }
 0x119   :  { %v783_v50 = vadd.f32 %v734_v49, %v701_v47  ;;  %v327_v51 = vpop.f32.mrb[1].mxu1  ;;  %v583_v53 = vpop.f32.mrb[1].mxu0 }
 0x11a   :  { %v784_v54 = vadd.f32 %v583_v53, %v327_v51 }
 0x11b   :  { %v594_v55 = vadd.f32 %v783_v50, %v51_v48 }
 0x11c   :  { %v593_v56 = vadd.f32 %v784_v54, %v50_v52 }
 0x11d   :  { %597 = vst.msk [vmem:[#allocation2 + $0x8] sm:$0xff] %vm47_vm1, %v594_v55 }
 0x11e   :  { %596 = vst.msk [vmem:[#allocation2] sm:$0xff] %vm47_vm1, %v593_v56 }
 0x124   :  { %v602_v58 = vld [vmem:[#allocation2 + $0x8] sm:$0xff] }
 0x125   :  { %v601_v59 = vld [vmem:[#allocation2] sm:$0xff]  ;;  %v611_v60 = vadd.f32 %v632_v57, %v602_v58 }
 0x126   :  { %v610_v61 = vadd.f32 %v632_v57, %v601_v59 }
 0x127   :  { %613 = vst.msk [vmem:[#allocation8 + $0x8] sm:$0xff] %vm47_vm1, %v611_v60 }
 0x128   :  { %612 = vst.msk [vmem:[#allocation8] sm:$0xff] %vm47_vm1, %v610_v61 }
 0x129   :  { %854 = shalt.err (!%p851_p6)
}
 0x12a   :  { %s855_s15 = scalar_lea.hbm %s966_s3, 256 }
 0x12b   :  { %p856_p7 = scmp.ne.s32.totalorder %s966_s3, %s855_s15  ;;  %p859_p8 = scmp.lt.u32.totalorder %s855_s15, %s966_s3 }
 0x12d   :  { %p861_p9 = pnand %p859_p8, %p856_p7 }
 0x12f   :  { %864 = shalt.err (!%p861_p9)
}
 0x130   :  { %625 = dma.vmem_to_hbm [thread:$0]  %s620_s12, 256, %s966_s3, [#allocation5], %s872_s22, %s872_s22, %s873_s23  }
 0x131   :  { %869 = dma.done.wait [#allocation5], 256  }
 0x132   :  { %870 = vsyncadd [#allocation5], 4294967040 }
 0x133   :  { %629 = vsyncpa [#allocation4], 1 }
 0x134   :  { %630 = vsyncpa [#allocation7], 1 }
 0x135   :  { %631 = vsyncpa [#allocation5], 1 }

</bundles_post_ra>
